<compile_context>
chip_gen: v6e
topology: v6e:2x2x1
jax: 0.10.0
libtpu: 0.0.40
codegen_flags: <defaults>
</compile_context>

<pallas_src>
import functools

import jax
import jax.numpy as jnp
import numpy as np
from jax import lax
from jax.experimental import pallas as pl
from jax.experimental.pallas import tpu as pltpu


def _round_up(v, m):
    return (v + m - 1) // m * m


def convt_matmul_kernel(w_ref, cols_ref, o_ref):
    # Whole batch in one MXU pass: (Cout, Kp) @ (Kp, N*Np).
    # Bias(+1000) lives in a spare contraction column, so there is no epilogue.
    o_ref[...] = jnp.dot(w_ref[...], cols_ref[...],
                         preferred_element_type=jnp.float32)


@functools.partial(jax.jit, static_argnames=("stride", "padding"))
def conv_transpose2d_plus_1000(x, W, b, *, stride=2, padding=1):
    """ConvTranspose2d(Cin->Cout, K, stride, padding) followed by +1000.

    x: (N, Cin, H, W)   NCHW (PyTorch convention)
    W: (Cin, Cout, KH, KW)  (PyTorch ConvTranspose2d weight layout)
    b: (Cout,)
    returns: (N, Cout, Ho, Wo) float32
    """
    N, Cin, H, Wd = x.shape
    Cin_w, Cout, KH, KW = W.shape
    assert Cin == Cin_w
    Ho = (H - 1) * stride - 2 * padding + KH
    Wo = (Wd - 1) * stride - 2 * padding + KW
    p = KH - 1 - padding  # TODO(synk): assumes padding <= K-1 and output_padding == 0
    assert p >= 0

    Kdim = Cin * KH * KW
    Npix = Ho * Wo
    Kp = _round_up(Kdim + 1, 8)      # +1 spare column for the folded bias(+1000)
    Np = _round_up(Npix, 128)        # lane-dense per-image pixel block

    # --- XLA-side glue (fuses into one producer of cols2d) ---------------------
    # Transposed conv == regular conv on a stride-dilated, padded input.
    # One lax.pad does both the zero-stuffing (interior padding) and border pad.
    xp = lax.pad(
        x.astype(jnp.float32), jnp.float32(0),
        ((0, 0, 0), (0, 0, 0), (p, p, stride - 1), (p, p, stride - 1)),
    )                                                   # (N, Cin, Hp, Wp)
    xp_t = jnp.transpose(xp, (1, 0, 2, 3))              # (Cin, N, Hp, Wp)

    # Tap-major im2col: row index = ci*KH*KW + kh*KW + kw (matches w_mat rows).
    patches = jnp.stack(
        [xp_t[:, :, kh:kh + Ho, kw:kw + Wo] for kh in range(KH) for kw in range(KW)],
        axis=1,
    )                                                   # (Cin, KH*KW, N, Ho, Wo)
    colsT = patches.reshape(Kdim, N, Npix)              # (Kdim, N, Npix)

    # One pad with constant 1.0:
    #  * rows Kdim..Kp-1 become the all-ones bias tap (+ rows multiplied by zero w),
    #  * padded lanes hold garbage that is cropped in the wrapper.
    colsT_p = lax.pad(colsT, jnp.float32(1.0),
                      ((0, Kp - Kdim, 0), (0, 0, 0), (0, Np - Npix, 0)))
    cols2d = colsT_p.reshape(Kp, N * Np)                # (Kp, N*Np), lane-dense

    # flipped + channel-transposed weights -> (Cout, Kdim); bias(+1000) in col Kdim,
    # remaining spare columns zero.
    w_mat = jnp.transpose(W[:, :, ::-1, ::-1], (1, 0, 2, 3)).reshape(Cout, Kdim)
    w_pad = jnp.concatenate(
        [w_mat.astype(jnp.float32),
         (b.astype(jnp.float32) + 1000.0).reshape(Cout, 1),
         jnp.zeros((Cout, Kp - Kdim - 1), jnp.float32)],
        axis=1,
    )                                                   # (Cout, Kp)

    # --- Pallas call: one grid step, one MXU pass -------------------------------
    bytes_accessed = 4 * (Cout * Kp + Kp * N * Np + Cout * N * Np)
    # VMEM guard: stays well under v7x's 64 MiB today; explicit limit avoids a
    # silent re-tiling cliff if H/W ever grow.
    vmem_limit = int(min(64 << 20, max(16 << 20, 3 * bytes_accessed + (4 << 20))))

    out_flat = pl.pallas_call(
        convt_matmul_kernel,
        out_shape=jax.ShapeDtypeStruct((Cout, N * Np), jnp.float32),
        grid=(1,),
        in_specs=[
            pl.BlockSpec((Cout, Kp), lambda i: (0, 0)),      # weights (+bias col)
            pl.BlockSpec((Kp, N * Np), lambda i: (0, 0)),    # batched cols
        ],
        out_specs=pl.BlockSpec((Cout, N * Np), lambda i: (0, 0)),
        compiler_params=pltpu.CompilerParams(
            dimension_semantics=("arbitrary",),
            vmem_limit_bytes=vmem_limit,
        ),
        cost_estimate=pl.CostEstimate(
            flops=2 * Cout * Kp * N * Np,
            transcendentals=0,
            bytes_accessed=bytes_accessed,
        ),
    )(w_pad, cols2d)

    # Crop padded lanes (they hold bias+1000 garbage) and restore NCHW.
    out = out_flat.reshape(Cout, N, Np)[:, :, :Npix].reshape(Cout, N, Ho, Wo)
    return jnp.transpose(out, (1, 0, 2, 3))


if __name__ == "__main__":
    key = jax.random.PRNGKey(0)
    k_x, k_w, k_b = jax.random.split(key, 3)

    # module: ConvTranspose2d(4, 8, 3, padding=1, stride=2); spec input (N, 4, 10, 10).
    # batch=2 to exercise the batched (Kp, N*Np) layout.
    x1 = jax.random.normal(k_x, (2, 4, 10, 10), dtype=jnp.float32)
    W = jax.random.normal(k_w, (4, 8, 3, 3), dtype=jnp.float32) * 0.1   # (Cin, Cout, KH, KW)
    b = jax.random.normal(k_b, (8,), dtype=jnp.float32) * 0.1

    out = conv_transpose2d_plus_1000(x1, W, b, stride=2, padding=1)
    out = jax.block_until_ready(out)
    assert out.shape == (2, 8, 19, 19), out.shape

    # sanity check against XLA's transposed-conv (conv with lhs dilation)
    ref = lax.conv_general_dilated(
        x1,
        jnp.transpose(W[:, :, ::-1, ::-1], (1, 0, 2, 3)),   # (Cout, Cin, KH, KW)
        window_strides=(1, 1),
        padding=[(1, 1), (1, 1)],
        lhs_dilation=(2, 2),
        dimension_numbers=("NCHW", "OIHW", "NCHW"),
    ) + b.reshape(1, -1, 1, 1) + 1000.0
    np.testing.assert_allclose(np.asarray(out), np.asarray(ref), rtol=1e-4, atol=1e-4)

    print("KERNEL_OK")
</pallas_src>

<mosaic_0001>
module attributes {stable_mosaic.version = 11 : i64} {
  func.func @convt_matmul_kernel(%arg0: i32, %arg1: memref<8x40xf32, #tpu.memory_space<vmem>>, %arg2: memref<40x768xf32, #tpu.memory_space<vmem>>, %arg3: memref<8x768xf32, #tpu.memory_space<vmem>>) attributes {dimension_semantics = [#tpu.dimension_semantics<arbitrary>], iteration_bounds = array<i64: 1>, scalar_prefetch = 0 : i64, scratch_operands = 0 : i64, tpu.core_type = #tpu.core_type<tc>, window_params = [{pipeline_mode = #tpu.pipeline_mode<synchronous>, transform_indices = @transform_0, window_bounds = array<i64: 8, 40>}, {pipeline_mode = #tpu.pipeline_mode<synchronous>, transform_indices = @transform_1, window_bounds = array<i64: 40, 768>}, {pipeline_mode = #tpu.pipeline_mode<synchronous>, transform_indices = @transform_2, window_bounds = array<i64: 8, 768>}]} {
    %c0 = arith.constant 0 : index
    %c0_0 = arith.constant 0 : index
    %0 = vector.load %arg1[%c0, %c0_0] : memref<8x40xf32, #tpu.memory_space<vmem>>, vector<8x40xf32>
    %c0_1 = arith.constant 0 : index
    %c0_2 = arith.constant 0 : index
    %1 = vector.load %arg2[%c0_1, %c0_2] : memref<40x768xf32, #tpu.memory_space<vmem>>, vector<40x768xf32>
    %cst = arith.constant dense<0.000000e+00> : vector<8x768xf32>
    %2 = tpu.matmul %0, %1, %cst {dimension_numbers = #tpu.dot_dimension_numbers<[1], [0], [0], [1], [0, 0, 1, 1], [], []>} : vector<8x40xf32>, vector<40x768xf32>, vector<8x768xf32> -> vector<8x768xf32>
    %c0_3 = arith.constant 0 : index
    %c0_4 = arith.constant 0 : index
    %3 = vector.load %arg3[%c0_3, %c0_4] : memref<8x768xf32, #tpu.memory_space<vmem>>, vector<8x768xf32>
    tpu.vector_store %arg3[%c0_3, %c0_4], %2 {strides = array<i32>} : memref<8x768xf32, #tpu.memory_space<vmem>>, vector<8x768xf32>,
    return
  }
  func.func @transform_0(%arg0: i32) -> (i32, i32) {
    %c0_i32 = arith.constant 0 : i32
    %c0_i32_0 = arith.constant 0 : i32
    %c0_i32_1 = arith.constant 0 : i32
    return %c0_i32, %c0_i32_0 : i32, i32
  }
  func.func @transform_1(%arg0: i32) -> (i32, i32) {
    %c0_i32 = arith.constant 0 : i32
    %c0_i32_0 = arith.constant 0 : i32
    %c0_i32_1 = arith.constant 0 : i32
    return %c0_i32, %c0_i32_0 : i32, i32
  }
  func.func @transform_2(%arg0: i32) -> (i32, i32) {
    %c0_i32 = arith.constant 0 : i32
    %c0_i32_0 = arith.constant 0 : i32
    %c0_i32_1 = arith.constant 0 : i32
    return %c0_i32, %c0_i32_0 : i32, i32
  }
}

</mosaic_0001>

<bundles_post_ra>
// kernel: conv_transpose2d_plus_1000.1
= control target key start
LH: loop header
LB: loop body
LE: loop exit
PB: predicated region body
PF: predicated region fallthrough
CT: control target
= control target key end

     0   :  { %v273_v3 = vmov 0.0   ;;  %vm42_vm0 = vcmask 326656   ;;  %s403_s1 = inlined_call_operand.vmem [shape: f32[40,768], index: 1, kind: input, shape index: {}]   ;;  %s404_s0 = inlined_call_operand.vmem [shape: f32[8,40], index: 0, kind: input, shape index: {}]   ;;  %s405_s2 = inlined_call_operand.vmem [shape: f32[8,768], index: 2, kind: output, shape index: {}]  }
   0x1   :  { %v37_v0 = vld [vmem:[%s403_s1 + $0xc8] sm:$0xff]  ;;  %v36_v1 = vld [vmem:[%s403_s1 + $0xc0] sm:$0xff]  ;;  %v31_v2 = vld [vmem:[%s403_s1 + $0x98] sm:$0xff]  ;;  %110 = vmatprep.mubr.f32.mxu0 %v273_v3  ;;  %181 = vmatprep.mubr.f32.mxu1 %v273_v3 }
   0x2   :  { %68 = vmatprep.subr.mxu0 %v37_v0  ;;  %v30_v4 = vld [vmem:[%s403_s1 + $0x90] sm:$0xff]  ;;  %v25_v5 = vld [vmem:[%s403_s1 + $0x68] sm:$0xff]  ;;  %v24_v6 = vld [vmem:[%s403_s1 + $0x60] sm:$0xff] }
   0x3   :  { %69 = vmatpush1.msra.mxu0 %v36_v1  ;;  %v39_v7 = vld [vmem:[%s403_s1 + $0xd8] sm:$0xff]  ;;  %v38_v8 = vld [vmem:[%s403_s1 + $0xd0] sm:$0xff]  ;;  %v33_v10 = vld [vmem:[%s403_s1 + $0xa8] sm:$0xff] }
   0x4   :  { %70 = vmatprep.subr.mxu0 %v31_v2  ;;  %v19_v9 = vld [vmem:[%s403_s1 + $0x38] sm:$0xff]  ;;  %139 = vmatprep.subr.mxu1 %v39_v7  ;;  %v18_v11 = vld [vmem:[%s403_s1 + $0x30] sm:$0xff]  ;;  %v32_v12 = vld [vmem:[%s403_s1 + $0xa0] sm:$0xff] }
   0x5   :  { %71 = vmatpush1.msra.mxu0 %v30_v4  ;;  %140 = vmatpush1.msra.mxu1 %v38_v8  ;;  %v27_v13 = vld [vmem:[%s403_s1 + $0x78] sm:$0xff]  ;;  %v13_v14 = vld [vmem:[%s403_s1 + $0x8] sm:$0xff]  ;;  %v26_v15 = vld [vmem:[%s403_s1 + $0x70] sm:$0xff] }
   0x6   :  { %72 = vmatprep.subr.mxu0 %v25_v5  ;;  %141 = vmatprep.subr.mxu1 %v33_v10  ;;  %v12_v16 = vld [vmem:[%s403_s1] sm:$0xff]  ;;  %v21_v17 = vld [vmem:[%s403_s1 + $0x48] sm:$0xff]  ;;  %v35_v22 = vld [vmem:[%s403_s1 + $0xb8] sm:$0xff] }
   0x7   :  { %73 = vmatpush1.msra.mxu0 %v24_v6  ;;  %142 = vmatpush1.msra.mxu1 %v32_v12  ;;  %v11_v18 = vld [vmem:[%s404_s0] sm:$0xff]  ;;  %v41_v19 = vld [vmem:[%s403_s1 + $0xe8] sm:$0xff]  ;;  %v15_v23 = vld [vmem:[%s403_s1 + $0x18] sm:$0xff] }
   0x8   :  { %74 = vmatprep.subr.mxu0 %v19_v9  ;;  %143 = vmatprep.subr.mxu1 %v27_v13  ;;  %v40_v20 = vld [vmem:[%s403_s1 + $0xe0] sm:$0xff]  ;;  %v34_v24 = vld [vmem:[%s403_s1 + $0xb0] sm:$0xff]  ;;  %v29_v26 = vld [vmem:[%s403_s1 + $0x88] sm:$0xff] }
   0x9   :  { %75 = vmatpush1.msra.mxu0 %v18_v11  ;;  %144 = vmatpush1.msra.mxu1 %v26_v15  ;;  %v20_v21 = vld [vmem:[%s403_s1 + $0x40] sm:$0xff]  ;;  %v14_v25 = vld [vmem:[%s403_s1 + $0x10] sm:$0xff]  ;;  %v23_v28 = vld [vmem:[%s403_s1 + $0x58] sm:$0xff] }
   0xa   :  { %76 = vmatprep.subr.mxu0 %v13_v14  ;;  %145 = vmatprep.subr.mxu1 %v21_v17  ;;  %v28_v27 = vld [vmem:[%s403_s1 + $0x80] sm:$0xff]  ;;  %v22_v29 = vld [vmem:[%s403_s1 + $0x50] sm:$0xff]  ;;  %v17_v30 = vld [vmem:[%s403_s1 + $0x28] sm:$0xff] }
   0xb   :  { %77 = vmatpush1.msra.mxu0 %v12_v16  ;;  %146 = vmatpush1.msra.mxu1 %v20_v21  ;;  %v16_v31 = vld [vmem:[%s403_s1 + $0x20] sm:$0xff] }
   0xc   :  { %269 = vmatmul.mubr.msk.f32.vlgmr.msra.gmra.mxu0 %vm42_vm0, %v11_v18  ;;  %210 = vmatprep.subr.mxu0 %v41_v19 }
   0xd   :  { %211 = vmatpush1.msra.mxu0 %v40_v20  ;;  %147 = vmatprep.subr.mxu1 %v15_v23 }
   0xe   :  { %212 = vmatprep.subr.mxu0 %v35_v22  ;;  %148 = vmatpush1.msra.mxu1 %v14_v25 }
   0xf   :  { %213 = vmatpush1.msra.mxu0 %v34_v24  ;;  %270 = vmatmul.mubr.msk.f32.vlgmr.msra.gmra.mxu1 %vm42_vm0, %v11_v18 }
  0x10   :  { %214 = vmatprep.subr.mxu0 %v29_v26  ;;  %252 = vmatprep.mubr.f32.mxu0 %v273_v3 }
  0x11   :  { %215 = vmatpush1.msra.mxu0 %v28_v27 }
  0x12   :  { %216 = vmatprep.subr.mxu0 %v23_v28 }
  0x13   :  { %217 = vmatpush1.msra.mxu0 %v22_v29 }
  0x14   :  { %218 = vmatprep.subr.mxu0 %v17_v30 }
  0x15   :  { %219 = vmatpush1.msra.mxu0 %v16_v31 }
  0x16   :  { %271 = vmatmul.mubr.msk.f32.vlgmr.msra.gmra.mxu0 %vm42_vm0, %v11_v18 }
  0xcc   :  { %v112_v32 = vpop.f32.mrf.mxu0 }
  0xcd   :  { %259 = vst [vmem:[%s405_s2] sm:$0xff] %v112_v32 }
  0xce   :  { %v114_v33 = vpop.f32.mrf.mxu0 }
  0xcf   :  { %260 = vst [vmem:[%s405_s2 + $0x8] sm:$0xff] %v114_v33  ;;  %v183_v34 = vpop.f32.mrf.mxu1 }
  0xd0   :  { %261 = vst [vmem:[%s405_s2 + $0x10] sm:$0xff] %v183_v34 }
  0xd1   :  { %v185_v35 = vpop.f32.mrf.mxu1 }
  0xd2   :  { %262 = vst [vmem:[%s405_s2 + $0x18] sm:$0xff] %v185_v35 }
  0xd6   :  { %v254_v36 = vpop.f32.mrf.mxu0 }
  0xd7   :  { %263 = vst [vmem:[%s405_s2 + $0x20] sm:$0xff] %v254_v36 }
  0xd8   :  { %v256_v37 = vpop.f32.mrf.mxu0 }
  0xd9   :  { %264 = vst [vmem:[%s405_s2 + $0x28] sm:$0xff] %v256_v37 }

</bundles_post_ra>
